<compile_context>
chip_gen: v7x
topology: tpu7x:2x2x1
jax: 0.10.0
libtpu: 0.0.40
codegen_flags: <defaults>
</compile_context>

<pallas_src>
import functools

import jax
import jax.numpy as jnp
from jax.experimental import pallas as pl
from jax.experimental.pallas import tpu as pltpu

INPUT_DIM = 256
LATENT_DIM = 64            # 2 * latent = 128 -> exactly one lane group
HIDDEN = 512               # fixed by the module
MAX_TILE_B = 256           # MXU M rows per step (128 already saturates v5e)


def _round_up(n, m):
    return ((n + m - 1) // m) * m


def _pick_tile_b(b, max_tile=MAX_TILE_B):
    """Largest sublane-aligned (multiple of 8) tile <= max_tile that divides round_up(b, 8).

    Keeps padded rows (wasted MXU work) to at most 7 while still giving big M tiles.
    e.g. b=8 -> 8; b=384 -> 192 (grid=2, zero pad); b=1000 -> 200 (grid=5, zero pad).
    """
    b8 = _round_up(b, 8)
    best = 8
    t = 8
    while t <= min(max_tile, b8):
        if b8 % t == 0:
            best = t
        t += 8
    return best


def _vae_kernel(latent_dim,
                x_ref, eps_ref,
                w1_ref, b1_ref, w2_ref, b2_ref,
                w3_ref, b3_ref, w4_ref, b4_ref,
                recon_ref, moments_ref):
    """One batch tile of the VAE forward.

    encoder : h = relu(x @ W1 + b1);  enc = h @ W2 + b2   (enc = [mean | log_var], 128 lanes)
    reparam : z = mean + eps * exp(0.5 * log_var)         (done 128 lanes wide, no vreg split)
    decoder : d = relu(z @ W3p + b3); recon = sigmoid(d @ W4 + b4)
              (W3p is W3 zero-padded to (2*latent, hidden), so the log_var half of the wide
               z vector multiplies zero rows and contributes nothing.)
    """
    f32 = jnp.float32
    bf16 = jnp.bfloat16

    # ---- encoder: bf16 MXU inputs, f32 accumulation ----
    x = x_ref[...].astype(bf16)
    h = jnp.dot(x, w1_ref[...], preferred_element_type=f32) + b1_ref[...]
    h = jnp.maximum(h, 0.0)
    enc = jnp.dot(h.astype(bf16), w2_ref[...], preferred_element_type=f32) + b2_ref[...]

    # Lane-dense 128-wide store of [mean | log_var]; split happens in the wrapper.
    moments_ref[...] = enc

    # ---- reparameterize without slicing inside a vreg ----
    # rolled  = [log_var | mean]   (XLU lane rotation, off the VPU critical path)
    # eps_ref = [eps     | zeros]  (padded in the wrapper)
    rolled = pltpu.roll(enc, shift=latent_dim, axis=1)
    z_wide = enc + eps_ref[...] * jnp.exp(0.5 * rolled)
    # z_wide[:, :latent] = mean + eps * std  (the real z)
    # z_wide[:, latent:] = log_var           (killed by the zero rows of W3p)

    # ---- decoder ----
    d = jnp.dot(z_wide.astype(bf16), w3_ref[...], preferred_element_type=f32) + b3_ref[...]
    d = jnp.maximum(d, 0.0)
    logits = jnp.dot(d.astype(bf16), w4_ref[...], preferred_element_type=f32) + b4_ref[...]
    recon_ref[...] = jax.nn.sigmoid(logits)


def vae_forward(x, eps, params, *, latent_dim=LATENT_DIM, tile_b=None):
    """Run the fused VAE forward as a single Pallas kernel, tiled over batch.

    Returns (recon, mean, log_var), matching the PyTorch module's forward().
    """
    w1, b1, w2, b2, w3p, b3, w4, b4 = params
    B, D_in = x.shape
    two_l = 2 * latent_dim

    if tile_b is None:
        tile_b = _pick_tile_b(B)
    b_pad = _round_up(B, tile_b)

    if b_pad != B:
        x = jnp.pad(x, ((0, b_pad - B), (0, 0)))
        eps = jnp.pad(eps, ((0, b_pad - B), (0, 0)))
    # Carry eps lane-dense at 128 wide: [eps | zeros].
    eps_wide = jnp.pad(eps, ((0, 0), (0, two_l - latent_dim)))

    grid = (b_pad // tile_b,)

    def bmap(i):          # batch-tiled operands
        return (i, 0)

    def rmap(i):          # replicated weights: same block every step (fetched once)
        return (0, 0)

    # NOTE: total bf16 weights ~0.75 MB, so double-buffered weight tiles are irrelevant;
    # if HIDDEN/INPUT_DIM grow, single-buffer them with pipeline_mode=pl.Buffered(1).
    full = lambda a: pl.BlockSpec(a.shape, rmap)

    in_specs = [
        pl.BlockSpec((tile_b, D_in), bmap),       # x
        pl.BlockSpec((tile_b, two_l), bmap),      # eps (128-wide, zero-padded)
        full(w1), full(b1), full(w2), full(b2),
        full(w3p), full(b3), full(w4), full(b4),
    ]
    out_specs = [
        pl.BlockSpec((tile_b, D_in), bmap),       # recon
        pl.BlockSpec((tile_b, two_l), bmap),      # [mean | log_var]
    ]
    out_shape = [
        jax.ShapeDtypeStruct((b_pad, D_in), jnp.float32),
        jax.ShapeDtypeStruct((b_pad, two_l), jnp.float32),
    ]

    recon, moments = pl.pallas_call(
        functools.partial(_vae_kernel, latent_dim),
        out_shape=out_shape,
        grid_spec=pltpu.PrefetchScalarGridSpec(
            num_scalar_prefetch=0,
            grid=grid,
            in_specs=in_specs,
            out_specs=out_specs,
        ),
        compiler_params=pltpu.CompilerParams(
            dimension_semantics=("parallel",),
            vmem_limit_bytes=32 * 1024 * 1024,
        ),
    )(x, eps_wide, w1, b1, w2, b2, w3p, b3, w4, b4)

    recon = recon[:B]
    mean = moments[:B, :latent_dim]
    log_var = moments[:B, latent_dim:]
    return recon, mean, log_var


def init_params(key, input_dim, latent_dim, hidden=HIDDEN):
    """PyTorch-Linear-style init (uniform +/- 1/sqrt(fan_in)); weights cast to bf16.

    Weights are stored as (in_features, out_features) so the kernel computes x @ W + b.
    W3 is zero-padded from (latent, hidden) to (2*latent, hidden) for the wide-z trick.
    """
    def linear(k, fan_in, fan_out):
        kw, kb = jax.random.split(k)
        bound = 1.0 / jnp.sqrt(fan_in)
        w = jax.random.uniform(kw, (fan_in, fan_out), jnp.float32, -bound, bound)
        b = jax.random.uniform(kb, (1, fan_out), jnp.float32, -bound, bound)
        return w.astype(jnp.bfloat16), b

    k1, k2, k3, k4 = jax.random.split(key, 4)
    w1, b1 = linear(k1, input_dim, hidden)            # encoder[0]
    w2, b2 = linear(k2, hidden, latent_dim * 2)       # encoder[2]
    w3, b3 = linear(k3, latent_dim, hidden)           # decoder[0]
    w4, b4 = linear(k4, hidden, input_dim)            # decoder[2]
    w3p = jnp.concatenate([w3, jnp.zeros((latent_dim, hidden), w3.dtype)], axis=0)
    return (w1, b1, w2, b2, w3p, b3, w4, b4)


def vae_forward_ref(x, eps, params, latent_dim=LATENT_DIM):
    """Pure-JAX reference mirroring the PyTorch forward with the same bf16/f32 precisions."""
    w1, b1, w2, b2, w3p, b3, w4, b4 = params
    w3 = w3p[:latent_dim]
    bf16, f32 = jnp.bfloat16, jnp.float32

    def mm(a, w):  # bf16 MXU inputs, f32 accumulation (matches the kernel)
        return jnp.dot(a.astype(bf16), w, preferred_element_type=f32)

    h = jnp.maximum(mm(x, w1) + b1, 0.0)
    enc = mm(h, w2) + b2
    mean, log_var = enc[:, :latent_dim], enc[:, latent_dim:]
    z = mean + eps * jnp.exp(0.5 * log_var)
    d = jnp.maximum(mm(z, w3) + b3, 0.0)
    recon = jax.nn.sigmoid(mm(d, w4) + b4)
    return recon, mean, log_var


if __name__ == "__main__":
    key = jax.random.PRNGKey(0)
    kx, keps, kp = jax.random.split(key, 3)
    params = init_params(kp, INPUT_DIM, LATENT_DIM)

    # batch=8: small single-tile case.  batch=384: multi-step grid (tile_b=192, grid=(2,)).
    for batch in (8, 384):
        kxb = jax.random.fold_in(kx, batch)
        kepsb = jax.random.fold_in(keps, batch)
        x = jax.random.uniform(kxb, (batch, INPUT_DIM), jnp.float32)      # "image" in [0,1)
        # eps is the randn_like of reparameterize, drawn deterministically here
        eps = jax.random.normal(kepsb, (batch, LATENT_DIM), jnp.float32)

        recon, mean, log_var = vae_forward(x, eps, params)
        jax.block_until_ready((recon, mean, log_var))

        r_ref, m_ref, lv_ref = vae_forward_ref(x, eps, params)
        assert recon.shape == (batch, INPUT_DIM)
        assert mean.shape == (batch, LATENT_DIM)
        assert log_var.shape == (batch, LATENT_DIM)
        assert jnp.allclose(recon, r_ref, atol=2e-2, rtol=2e-2)
        assert jnp.allclose(mean, m_ref, atol=2e-2, rtol=2e-2)
        assert jnp.allclose(log_var, lv_ref, atol=2e-2, rtol=2e-2)

    print("KERNEL_OK")
</pallas_src>

<mosaic_0001>
module attributes {stable_mosaic.version = 11 : i64} {
  func.func @_vae_kernel(%arg0: i32, %arg1: memref<8x256xf32, #tpu.memory_space<vmem>>, %arg2: memref<8x128xf32, #tpu.memory_space<vmem>>, %arg3: memref<256x512xbf16, #tpu.memory_space<vmem>>, %arg4: memref<1x512xf32, #tpu.memory_space<vmem>>, %arg5: memref<512x128xbf16, #tpu.memory_space<vmem>>, %arg6: memref<1x128xf32, #tpu.memory_space<vmem>>, %arg7: memref<128x512xbf16, #tpu.memory_space<vmem>>, %arg8: memref<1x512xf32, #tpu.memory_space<vmem>>, %arg9: memref<512x256xbf16, #tpu.memory_space<vmem>>, %arg10: memref<1x256xf32, #tpu.memory_space<vmem>>, %arg11: memref<8x256xf32, #tpu.memory_space<vmem>>, %arg12: memref<8x128xf32, #tpu.memory_space<vmem>>) attributes {dimension_semantics = [#tpu.dimension_semantics<parallel>], iteration_bounds = array<i64: 1>, scalar_prefetch = 0 : i64, scratch_operands = 0 : i64, tpu.core_type = #tpu.core_type<tc>, window_params = [{transform_indices = @transform_0, window_bounds = array<i64: 8, 256>}, {transform_indices = @transform_1, window_bounds = array<i64: 8, 128>}, {pipeline_mode = #tpu.pipeline_mode<synchronous>, transform_indices = @transform_2, window_bounds = array<i64: 256, 512>}, {pipeline_mode = #tpu.pipeline_mode<synchronous>, transform_indices = @transform_3, window_bounds = array<i64: 1, 512>}, {pipeline_mode = #tpu.pipeline_mode<synchronous>, transform_indices = @transform_4, window_bounds = array<i64: 512, 128>}, {pipeline_mode = #tpu.pipeline_mode<synchronous>, transform_indices = @transform_5, window_bounds = array<i64: 1, 128>}, {pipeline_mode = #tpu.pipeline_mode<synchronous>, transform_indices = @transform_6, window_bounds = array<i64: 128, 512>}, {pipeline_mode = #tpu.pipeline_mode<synchronous>, transform_indices = @transform_7, window_bounds = array<i64: 1, 512>}, {pipeline_mode = #tpu.pipeline_mode<synchronous>, transform_indices = @transform_8, window_bounds = array<i64: 512, 256>}, {pipeline_mode = #tpu.pipeline_mode<synchronous>, transform_indices = @transform_9, window_bounds = array<i64: 1, 256>}, {transform_indices = @transform_10, window_bounds = array<i64: 8, 256>}, {transform_indices = @transform_11, window_bounds = array<i64: 8, 128>}]} {
    %c0 = arith.constant 0 : index
    %c0_0 = arith.constant 0 : index
    %0 = vector.load %arg1[%c0, %c0_0] : memref<8x256xf32, #tpu.memory_space<vmem>>, vector<8x256xf32>
    %1 = arith.truncf %0 : vector<8x256xf32> to vector<8x256xbf16>
    %c0_1 = arith.constant 0 : index
    %c0_2 = arith.constant 0 : index
    %2 = vector.load %arg3[%c0_1, %c0_2] : memref<256x512xbf16, #tpu.memory_space<vmem>>, vector<256x512xbf16>
    %cst = arith.constant dense<0.000000e+00> : vector<8x512xf32>
    %3 = tpu.matmul %1, %2, %cst {dimension_numbers = #tpu.dot_dimension_numbers<[1], [0], [0], [1], [0, 0, 1, 1], [], []>} : vector<8x256xbf16>, vector<256x512xbf16>, vector<8x512xf32> -> vector<8x512xf32>
    %c0_3 = arith.constant 0 : index
    %c0_4 = arith.constant 0 : index
    %4 = vector.load %arg4[%c0_3, %c0_4] : memref<1x512xf32, #tpu.memory_space<vmem>>, vector<1x512xf32>
    %5 = vector.broadcast %4 : vector<1x512xf32> to vector<8x512xf32>
    %6 = arith.addf %3, %5 : vector<8x512xf32>
    %cst_5 = arith.constant 0.000000e+00 : f32
    %7 = vector.broadcast %cst_5 : f32 to vector<8x512xf32>
    %8 = arith.maximumf %6, %7 : vector<8x512xf32>
    %9 = arith.truncf %8 : vector<8x512xf32> to vector<8x512xbf16>
    %c0_6 = arith.constant 0 : index
    %c0_7 = arith.constant 0 : index
    %10 = vector.load %arg5[%c0_6, %c0_7] : memref<512x128xbf16, #tpu.memory_space<vmem>>, vector<512x128xbf16>
    %cst_8 = arith.constant dense<0.000000e+00> : vector<8x128xf32>
    %11 = tpu.matmul %9, %10, %cst_8 {dimension_numbers = #tpu.dot_dimension_numbers<[1], [0], [0], [1], [0, 0, 1, 1], [], []>} : vector<8x512xbf16>, vector<512x128xbf16>, vector<8x128xf32> -> vector<8x128xf32>
    %c0_9 = arith.constant 0 : index
    %c0_10 = arith.constant 0 : index
    %12 = vector.load %arg6[%c0_9, %c0_10] : memref<1x128xf32, #tpu.memory_space<vmem>>, vector<1x128xf32>
    %13 = vector.broadcast %12 : vector<1x128xf32> to vector<8x128xf32>
    %14 = arith.addf %11, %13 : vector<8x128xf32>
    %c0_11 = arith.constant 0 : index
    %c0_12 = arith.constant 0 : index
    %15 = vector.load %arg12[%c0_11, %c0_12] : memref<8x128xf32, #tpu.memory_space<vmem>>, vector<8x128xf32>
    tpu.vector_store %arg12[%c0_11, %c0_12], %14 {strides = array<i32>} : memref<8x128xf32, #tpu.memory_space<vmem>>, vector<8x128xf32>,
    %c64_i32 = arith.constant 64 : i32
    %16 = tpu.dynamic_rotate %14 by %c64_i32 dim 1 : vector<8x128xf32>, i32 -> vector<8x128xf32>
    %c0_13 = arith.constant 0 : index
    %c0_14 = arith.constant 0 : index
    %17 = vector.load %arg2[%c0_13, %c0_14] : memref<8x128xf32, #tpu.memory_space<vmem>>, vector<8x128xf32>
    %cst_15 = arith.constant 5.000000e-01 : f32
    %18 = vector.broadcast %cst_15 : f32 to vector<8x128xf32>
    %19 = arith.mulf %18, %16 : vector<8x128xf32>
    %20 = math.exp %19 : vector<8x128xf32>
    %21 = arith.mulf %17, %20 : vector<8x128xf32>
    %22 = arith.addf %14, %21 : vector<8x128xf32>
    %23 = arith.truncf %22 : vector<8x128xf32> to vector<8x128xbf16>
    %c0_16 = arith.constant 0 : index
    %c0_17 = arith.constant 0 : index
    %24 = vector.load %arg7[%c0_16, %c0_17] : memref<128x512xbf16, #tpu.memory_space<vmem>>, vector<128x512xbf16>
    %cst_18 = arith.constant dense<0.000000e+00> : vector<8x512xf32>
    %25 = tpu.matmul %23, %24, %cst_18 {dimension_numbers = #tpu.dot_dimension_numbers<[1], [0], [0], [1], [0, 0, 1, 1], [], []>} : vector<8x128xbf16>, vector<128x512xbf16>, vector<8x512xf32> -> vector<8x512xf32>
    %c0_19 = arith.constant 0 : index
    %c0_20 = arith.constant 0 : index
    %26 = vector.load %arg8[%c0_19, %c0_20] : memref<1x512xf32, #tpu.memory_space<vmem>>, vector<1x512xf32>
    %27 = vector.broadcast %26 : vector<1x512xf32> to vector<8x512xf32>
    %28 = arith.addf %25, %27 : vector<8x512xf32>
    %cst_21 = arith.constant 0.000000e+00 : f32
    %29 = vector.broadcast %cst_21 : f32 to vector<8x512xf32>
    %30 = arith.maximumf %28, %29 : vector<8x512xf32>
    %31 = arith.truncf %30 : vector<8x512xf32> to vector<8x512xbf16>
    %c0_22 = arith.constant 0 : index
    %c0_23 = arith.constant 0 : index
    %32 = vector.load %arg9[%c0_22, %c0_23] : memref<512x256xbf16, #tpu.memory_space<vmem>>, vector<512x256xbf16>
    %cst_24 = arith.constant dense<0.000000e+00> : vector<8x256xf32>
    %33 = tpu.matmul %31, %32, %cst_24 {dimension_numbers = #tpu.dot_dimension_numbers<[1], [0], [0], [1], [0, 0, 1, 1], [], []>} : vector<8x512xbf16>, vector<512x256xbf16>, vector<8x256xf32> -> vector<8x256xf32>
    %c0_25 = arith.constant 0 : index
    %c0_26 = arith.constant 0 : index
    %34 = vector.load %arg10[%c0_25, %c0_26] : memref<1x256xf32, #tpu.memory_space<vmem>>, vector<1x256xf32>
    %35 = vector.broadcast %34 : vector<1x256xf32> to vector<8x256xf32>
    %36 = arith.addf %33, %35 : vector<8x256xf32>
    %37 = arith.negf %36 : vector<8x256xf32>
    %38 = math.exp %37 : vector<8x256xf32>
    %cst_27 = arith.constant 1.000000e+00 : f32
    %39 = vector.broadcast %cst_27 : f32 to vector<8x256xf32>
    %40 = arith.addf %39, %38 : vector<8x256xf32>
    %41 = arith.divf %39, %40 : vector<8x256xf32>
    %c0_28 = arith.constant 0 : index
    %c0_29 = arith.constant 0 : index
    %42 = vector.load %arg11[%c0_28, %c0_29] : memref<8x256xf32, #tpu.memory_space<vmem>>, vector<8x256xf32>
    tpu.vector_store %arg11[%c0_28, %c0_29], %41 {strides = array<i32>} : memref<8x256xf32, #tpu.memory_space<vmem>>, vector<8x256xf32>,
    return
  }
  func.func @transform_0(%arg0: i32) -> (i32, i32) {
    %c0_i32 = arith.constant 0 : i32
    %c0_i32_0 = arith.constant 0 : i32
    return %arg0, %c0_i32 : i32, i32
  }
  func.func @transform_1(%arg0: i32) -> (i32, i32) {
    %c0_i32 = arith.constant 0 : i32
    %c0_i32_0 = arith.constant 0 : i32
    return %arg0, %c0_i32 : i32, i32
  }
  func.func @transform_2(%arg0: i32) -> (i32, i32) {
    %c0_i32 = arith.constant 0 : i32
    %c0_i32_0 = arith.constant 0 : i32
    %c0_i32_1 = arith.constant 0 : i32
    return %c0_i32, %c0_i32_0 : i32, i32
  }
  func.func @transform_3(%arg0: i32) -> (i32, i32) {
    %c0_i32 = arith.constant 0 : i32
    %c0_i32_0 = arith.constant 0 : i32
    %c0_i32_1 = arith.constant 0 : i32
    return %c0_i32, %c0_i32_0 : i32, i32
  }
  func.func @transform_4(%arg0: i32) -> (i32, i32) {
    %c0_i32 = arith.constant 0 : i32
    %c0_i32_0 = arith.constant 0 : i32
    %c0_i32_1 = arith.constant 0 : i32
    return %c0_i32, %c0_i32_0 : i32, i32
  }
  func.func @transform_5(%arg0: i32) -> (i32, i32) {
    %c0_i32 = arith.constant 0 : i32
    %c0_i32_0 = arith.constant 0 : i32
    %c0_i32_1 = arith.constant 0 : i32
    return %c0_i32, %c0_i32_0 : i32, i32
  }
  func.func @transform_6(%arg0: i32) -> (i32, i32) {
    %c0_i32 = arith.constant 0 : i32
    %c0_i32_0 = arith.constant 0 : i32
    %c0_i32_1 = arith.constant 0 : i32
    return %c0_i32, %c0_i32_0 : i32, i32
  }
  func.func @transform_7(%arg0: i32) -> (i32, i32) {
    %c0_i32 = arith.constant 0 : i32
    %c0_i32_0 = arith.constant 0 : i32
    %c0_i32_1 = arith.constant 0 : i32
    return %c0_i32, %c0_i32_0 : i32, i32
  }
  func.func @transform_8(%arg0: i32) -> (i32, i32) {
    %c0_i32 = arith.constant 0 : i32
    %c0_i32_0 = arith.constant 0 : i32
    %c0_i32_1 = arith.constant 0 : i32
    return %c0_i32, %c0_i32_0 : i32, i32
  }
  func.func @transform_9(%arg0: i32) -> (i32, i32) {
    %c0_i32 = arith.constant 0 : i32
    %c0_i32_0 = arith.constant 0 : i32
    %c0_i32_1 = arith.constant 0 : i32
    return %c0_i32, %c0_i32_0 : i32, i32
  }
  func.func @transform_10(%arg0: i32) -> (i32, i32) {
    %c0_i32 = arith.constant 0 : i32
    %c0_i32_0 = arith.constant 0 : i32
    return %arg0, %c0_i32 : i32, i32
  }
  func.func @transform_11(%arg0: i32) -> (i32, i32) {
    %c0_i32 = arith.constant 0 : i32
    %c0_i32_0 = arith.constant 0 : i32
    return %arg0, %c0_i32 : i32, i32
  }
}

</mosaic_0001>

<bundles_post_ra>
// kernel: tpu_custom_call.1
= control target key start
LH: loop header
LB: loop body
LE: loop exit
PB: predicated region body
PF: predicated region fallthrough
CT: control target
= control target key end

     0   :  { %17 = vsyncpa [#allocation3], 0  ;;  %s2777_s0 = inlined_call_operand.hbm [shape: f32[8,256], index: 0, kind: input, shape index: {}]   ;;  %s2778_s1 = inlined_call_operand.hbm [shape: f32[8,128], index: 1, kind: input, shape index: {}]   ;;  %s2779_s2 = inlined_call_operand.hbm [shape: bf16[256,512], index: 2, kind: input, shape index: {}]   ;;  %s2780_s3 = inlined_call_operand.vmem [shape: f32[1,512], index: 3, kind: input, shape index: {}]   ;;  %s2781_s4 = inlined_call_operand.hbm [shape: bf16[512,128], index: 4, kind: input, shape index: {}]   ;;  %s2782_s5 = inlined_call_operand.vmem [shape: f32[1,128], index: 5, kind: input, shape index: {}]   ;;  %s2783_s6 = inlined_call_operand.hbm [shape: bf16[128,512], index: 6, kind: input, shape index: {}]   ;;  %s2784_s7 = inlined_call_operand.vmem [shape: f32[1,512], index: 7, kind: input, shape index: {}]   ;;  %s2785_s8 = inlined_call_operand.hbm [shape: bf16[512,256], index: 8, kind: input, shape index: {}]   ;;  %s2786_s9 = inlined_call_operand.vmem [shape: f32[1,256], index: 9, kind: input, shape index: {}]   ;;  %s2787_s10 = inlined_call_operand.hbm [shape: f32[8,256], index: 10, kind: output, shape index: {0}]   ;;  %s2788_s11 = inlined_call_operand.hbm [shape: f32[8,128], index: 11, kind: output, shape index: {1}]  }
   0x1   :  { %18 = vsyncpa [#allocation6], 0 }
   0x2   :  { %19 = vsyncpa [#allocation9], 0 }
   0x3   :  { %20 = vsyncpa [#allocation12], 0 }
   0x4   :  { %21 = vsyncpa [#allocation4], 0 }
   0x5   :  { %22 = vsyncpa [#allocation15], 0  ;;  %s2529_s17 = smov [#allocation5]   ;;  %s2530_s19 = smov [#allocation8]  }
   0x6   :  { %s39_s18 = sshll.u32 %s2529_s17, 4  ;;  %s62_s20 = sshll.u32 %s2530_s19, 4  ;;  %s40_s18 = int_to_ptr.vmem [resolvable:$true] %s39_s18  ;;  %s2604_s20 = int_to_ptr.vmem [resolvable:$true] %s62_s20 }
   0x7   :  { %s2341_s23 = scalar_lea.hbm %s2778_s1, 128 }
   0x8   :  { %p2342_p0 = scmp.ne.s32.totalorder %s2778_s1, %s2341_s23  ;;  %p2345_p1 = scmp.lt.u32.totalorder %s2341_s23, %s2778_s1 }
   0xa   :  { %p2347_p2 = pnand %p2345_p1, %p2342_p0 }
   0xc   :  { %2350 = shalt.err (!%p2347_p2)
}
   0xd   :  { %s2351_s28 = scalar_lea.vmem %s40_s18, 128  ;;  %p2356_p4 = scmp.lt.s32.totalorder %s40_s18, %s40_s18 }
   0xe   :  { %p2352_p3 = scmp.ne.s32.totalorder %s40_s18, %s2351_s28  ;;  %p2357_p5 = scmp.lt.s32.totalorder %s2351_s28, %s2351_s28 }
  0x10   :  { %p2358_p6 = por %p2357_p5, %p2356_p4 }
  0x12   :  { %p2359_p7 = pnand %p2358_p6, %p2352_p3 }
  0x14   :  { %2362 = shalt.err (!%p2359_p7)
}
  0x15   :  { %42 = dma.hbm_to_vmem [thread:$0]  %s2778_s1, 128, %s40_s18, [#allocation6]  }
  0x16   :  { %s2363_s14 = scalar_lea.hbm %s2781_s4, 4096 }
  0x17   :  { %p2364_p8 = scmp.ne.s32.totalorder %s2781_s4, %s2363_s14  ;;  %p2367_p9 = scmp.lt.u32.totalorder %s2363_s14, %s2781_s4 }
  0x19   :  { %p2369_p10 = pnand %p2367_p9, %p2364_p8 }
  0x1b   :  { %2372 = shalt.err (!%p2369_p10)
}
  0x1c   :  { %s2373_s21 = scalar_lea.vmem %s2604_s20, 4096  ;;  %p2378_p12 = scmp.lt.s32.totalorder %s2604_s20, %s2604_s20 }
  0x1d   :  { %p2374_p11 = scmp.ne.s32.totalorder %s2604_s20, %s2373_s21  ;;  %p2379_p13 = scmp.lt.s32.totalorder %s2373_s21, %s2373_s21 }
  0x1f   :  { %p2380_p0 = por %p2379_p13, %p2378_p12 }
  0x21   :  { %p2381_p1 = pnand %p2380_p0, %p2374_p11 }
  0x23   :  { %2384 = shalt.err (!%p2381_p1)
}
  0x24   :  { %s2531_s1 = smov 64   ;;  %s2532_s18 = smov 4  }
  0x25   :  { %68 = dma.hbm_to_vmem [thread:$0]  %s2781_s4, 4096, %s2604_s20, [#allocation9], %s2531_s1, %s2531_s1, %s2532_s18  }
  0x26   :  { %s2533_s24 = smov [#allocation2]   ;;  %s2534_s26 = smov [#allocation7]  }
  0x27   :  { %s29_s25 = sshll.u32 %s2533_s24, 4  ;;  %s48_s27 = sshll.u32 %s2534_s26, 4  ;;  %s30_s25 = int_to_ptr.vmem [resolvable:$true] %s29_s25  ;;  %s2637_s27 = int_to_ptr.vmem [resolvable:$true] %s48_s27 }
  0x28   :  { %s2385_s30 = scalar_lea.hbm %s2777_s0, 256 }
  0x29   :  { %p2386_p2 = scmp.ne.s32.totalorder %s2777_s0, %s2385_s30  ;;  %p2389_p3 = scmp.lt.u32.totalorder %s2385_s30, %s2777_s0 }
  0x2b   :  { %p2391_p4 = pnand %p2389_p3, %p2386_p2 }
  0x2d   :  { %2394 = shalt.err (!%p2391_p4)
}
  0x2e   :  { %s2395_s4 = scalar_lea.vmem %s30_s25, 256  ;;  %p2400_p6 = scmp.lt.s32.totalorder %s30_s25, %s30_s25 }
  0x2f   :  { %p2396_p5 = scmp.ne.s32.totalorder %s30_s25, %s2395_s4  ;;  %p2401_p7 = scmp.lt.s32.totalorder %s2395_s4, %s2395_s4 }
  0x31   :  { %p2402_p8 = por %p2401_p7, %p2400_p6 }
  0x33   :  { %p2403_p9 = pnand %p2402_p8, %p2396_p5 }
  0x35   :  { %2406 = shalt.err (!%p2403_p9)
}
  0x36   :  { %32 = dma.hbm_to_vmem [thread:$0]  %s2777_s0, 256, %s30_s25, [#allocation3]  }
  0x37   :  { %s2407_s21 = scalar_lea.hbm %s2779_s2, 8192 }
  0x38   :  { %p2408_p10 = scmp.ne.s32.totalorder %s2779_s2, %s2407_s21  ;;  %p2411_p11 = scmp.lt.u32.totalorder %s2407_s21, %s2779_s2 }
  0x3a   :  { %p2413_p12 = pnand %p2411_p11, %p2408_p10 }
  0x3c   :  { %2416 = shalt.err (!%p2413_p12)
}
  0x3d   :  { %s2417_s26 = scalar_lea.vmem %s2637_s27, 8192  ;;  %p2422_p0 = scmp.lt.s32.totalorder %s2637_s27, %s2637_s27 }
  0x3e   :  { %p2418_p13 = scmp.ne.s32.totalorder %s2637_s27, %s2417_s26  ;;  %p2423_p1 = scmp.lt.s32.totalorder %s2417_s26, %s2417_s26 }
  0x40   :  { %p2424_p2 = por %p2423_p1, %p2422_p0 }
  0x42   :  { %p2425_p3 = pnand %p2424_p2, %p2418_p13 }
  0x44   :  { %2428 = shalt.err (!%p2425_p3)
}
  0x45   :  { %s2535_s0 = smov 256   ;;  %s2536_s25 = smov 16  }
  0x46   :  { %54 = dma.hbm_to_vmem [thread:$0]  %s2779_s2, 8192, %s2637_s27, [#allocation6], %s2535_s0, %s2535_s0, %s2536_s25  }
  0x47   :  { %s2537_s30 = smov [#allocation10]   ;;  %s2538_s13 = smov [#allocation11]  }
  0x48   :  { %s76_s12 = sshll.u32 %s2537_s30, 4  ;;  %s90_s14 = sshll.u32 %s2538_s13, 4  ;;  %s77_s12 = int_to_ptr.vmem [resolvable:$true] %s76_s12  ;;  %s2668_s14 = int_to_ptr.vmem [resolvable:$true] %s90_s14 }
  0x49   :  { %s2429_s20 = scalar_lea.hbm %s2783_s6, 4096 }
  0x4a   :  { %p2430_p4 = scmp.ne.s32.totalorder %s2783_s6, %s2429_s20  ;;  %p2433_p5 = scmp.lt.u32.totalorder %s2429_s20, %s2783_s6 }
  0x4c   :  { %p2435_p6 = pnand %p2433_p5, %p2430_p4 }
  0x4e   :  { %2438 = shalt.err (!%p2435_p6)
}
  0x4f   :  { %s2439_s2 = scalar_lea.vmem %s77_s12, 4096  ;;  %p2444_p8 = scmp.lt.s32.totalorder %s77_s12, %s77_s12 }
  0x50   :  { %p2440_p7 = scmp.ne.s32.totalorder %s77_s12, %s2439_s2  ;;  %p2445_p9 = scmp.lt.s32.totalorder %s2439_s2, %s2439_s2 }
  0x52   :  { %p2446_p10 = por %p2445_p9, %p2444_p8 }
  0x54   :  { %p2447_p11 = pnand %p2446_p10, %p2440_p7 }
  0x56   :  { %2450 = shalt.err (!%p2447_p11)
}
  0x57   :  { %82 = dma.hbm_to_vmem [thread:$0]  %s2783_s6, 4096, %s77_s12, [#allocation9], %s2535_s0, %s2535_s0, %s2536_s25  }
  0x58   :  { %s2451_s24 = scalar_lea.hbm %s2785_s8, 8192 }
  0x59   :  { %p2452_p12 = scmp.ne.s32.totalorder %s2785_s8, %s2451_s24  ;;  %p2455_p13 = scmp.lt.u32.totalorder %s2451_s24, %s2785_s8 }
  0x5b   :  { %p2457_p0 = pnand %p2455_p13, %p2452_p12 }
  0x5d   :  { %2460 = shalt.err (!%p2457_p0)
}
  0x5e   :  { %s2461_s13 = scalar_lea.vmem %s2668_s14, 8192  ;;  %p2466_p2 = scmp.lt.s32.totalorder %s2668_s14, %s2668_s14 }
  0x5f   :  { %p2462_p1 = scmp.ne.s32.totalorder %s2668_s14, %s2461_s13  ;;  %p2467_p3 = scmp.lt.s32.totalorder %s2461_s13, %s2461_s13 }
  0x61   :  { %p2468_p4 = por %p2467_p3, %p2466_p2 }
  0x63   :  { %p2469_p5 = pnand %p2468_p4, %p2462_p1 }
  0x65   :  { %2472 = shalt.err (!%p2469_p5)
}
  0x66   :  { %s2539_s6 = smov 128   ;;  %s2540_s0 = smov 8  }
  0x67   :  { %96 = dma.hbm_to_vmem [thread:$0]  %s2785_s8, 8192, %s2668_s14, [#allocation12], %s2539_s6, %s2539_s6, %s2540_s0  }
  0x68   :  { %2517 = dma.done.wait [#allocation3], 256  }
  0x69   :  { %2518 = vsyncadd [#allocation3], 4294967040 }
  0x6a   :  { %2519 = dma.done.wait [#allocation6], 8320  }
  0x6b   :  { %2520 = vsyncadd [#allocation6], 4294958976 }
  0x6c   :  { %2521 = dma.done.wait [#allocation9], 8192  }
  0x6d   :  { %2522 = vsyncadd [#allocation9], 4294959104 }
  0x6e   :  { %2523 = dma.done.wait [#allocation12], 8192  }
  0x6f   :  { %2524 = vsyncadd [#allocation12], 4294959104  ;;  %v2059_v0 = vld [vmem:[#allocation7 + $0x4] ss:$16 sps:$4 sm:$0xff]   ;;  %v2061_v1 = vld [vmem:[#allocation7] ss:$16 sps:$4 sm:$0xff]  }
  0x70   :  { %528 = vmatprep.subr.bf16.mxu1 %v2059_v0  ;;  %v2062_v2 = vld [vmem:[#allocation7 + $0x24] ss:$16 sps:$4 sm:$0xff]   ;;  %v2064_v3 = vld [vmem:[#allocation7 + $0x20] ss:$16 sps:$4 sm:$0xff]   ;;  %v2157_v31 = vld [vmem:[#allocation8 + $0x48] sm:$0xff]  }
  0x71   :  { %529 = vmatpush1.bf16.msra.mxu1 %v2061_v1  ;;  %v2065_v4 = vld [vmem:[#allocation7 + $0x44] ss:$16 sps:$4 sm:$0xff]   ;;  %v2067_v5 = vld [vmem:[#allocation7 + $0x40] ss:$16 sps:$4 sm:$0xff]   ;;  %v2158_v32 = vld [vmem:[#allocation8 + $0x8] sm:$0xff]  }
  0x72   :  { %530 = vmatprep.subr.bf16.mxu1 %v2062_v2  ;;  %v2068_v6 = vld [vmem:[#allocation7 + $0x64] ss:$16 sps:$4 sm:$0xff]   ;;  %v2070_v7 = vld [vmem:[#allocation7 + $0x60] ss:$16 sps:$4 sm:$0xff]   ;;  %v2161_v37 = vld [vmem:[#allocation8 + $0x58] sm:$0xff]  }
  0x73   :  { %v2071_v8 = vld [vmem:[#allocation7 + $0x84] ss:$16 sps:$4 sm:$0xff]   ;;  %v2073_v9 = vld [vmem:[#allocation7 + $0x80] ss:$16 sps:$4 sm:$0xff]   ;;  %v2162_v40 = vld [vmem:[#allocation8 + $0x18] sm:$0xff]  }
  0x74   :  { %v2074_v10 = vld [vmem:[#allocation7 + $0xa4] ss:$16 sps:$4 sm:$0xff]   ;;  %v2076_v11 = vld [vmem:[#allocation7 + $0xa0] ss:$16 sps:$4 sm:$0xff]   ;;  %v118_v43 = vld [vmem:[#allocation2] sm:$0xff] }
  0x75   :  { %531 = vmatpush1.bf16.msra.mxu1 %v2064_v3  ;;  %v2077_v12 = vld [vmem:[#allocation7 + $0xc4] ss:$16 sps:$4 sm:$0xff]   ;;  %v2079_v15 = vld [vmem:[#allocation7 + $0xc0] ss:$16 sps:$4 sm:$0xff]   ;;  %v2109_v45 = vld [vmem:[#allocation7 + $0xc] ss:$16 sps:$4 sm:$0xff]   ;;  %v2702_v48 = vpack.c.bf16 %v118_v43, %v118_v43 }
  0x76   :  { %532 = vmatprep.subr.bf16.mxu1 %v2065_v4  ;;  %v119_v13 = vld [vmem:[#allocation2 + $0x8] sm:$0xff]  ;;  %v2155_v27 = vld [vmem:[#allocation8 + $0x40] sm:$0xff]   ;;  %v2165_v46 = vld [vmem:[#allocation8 + $0x68] sm:$0xff]  }
  0x77   :  { %v2699_v14 = vpack.c.bf16 %v119_v13, %v119_v13  ;;  %v2080_v16 = vld [vmem:[#allocation7 + $0xe4] ss:$16 sps:$4 sm:$0xff]   ;;  %v2082_v17 = vld [vmem:[#allocation7 + $0xe0] ss:$16 sps:$4 sm:$0xff]   ;;  %1994 = vmatprep.subr.bf16.mxu0 %v2155_v27  ;;  %v2107_v47 = vld [vmem:[#allocation7 + $0x8] ss:$16 sps:$4 sm:$0xff]  }
  0x78   :  { %v2083_v18 = vld [vmem:[#allocation7 + $0x104] ss:$16 sps:$4 sm:$0xff]   ;;  %v2085_v19 = vld [vmem:[#allocation7 + $0x100] ss:$16 sps:$4 sm:$0xff]   ;;  %v2112_v49 = vld [vmem:[#allocation7 + $0x2c] ss:$16 sps:$4 sm:$0xff]  }
  0x79   :  { %533 = vmatpush1.bf16.msra.mxu1 %v2067_v5  ;;  %560 = vmatprep.mubr.bf16.mxu1 %v2699_v14  ;;  %v2086_v20 = vld [vmem:[#allocation7 + $0x124] ss:$16 sps:$4 sm:$0xff]   ;;  %v2088_v21 = vld [vmem:[#allocation7 + $0x120] ss:$16 sps:$4 sm:$0xff]   ;;  %v2166_v50 = vld [vmem:[#allocation8 + $0x28] sm:$0xff]  }
  0x7a   :  { %534 = vmatprep.subr.bf16.mxu1 %v2068_v6  ;;  %v2089_v22 = vld [vmem:[#allocation7 + $0x144] ss:$16 sps:$4 sm:$0xff]   ;;  %v2091_v23 = vld [vmem:[#allocation7 + $0x140] ss:$16 sps:$4 sm:$0xff]   ;;  %v2110_v51 = vld [vmem:[#allocation7 + $0x28] ss:$16 sps:$4 sm:$0xff]  }
  0x7b   :  { %v2092_v24 = vld [vmem:[#allocation7 + $0x164] ss:$16 sps:$4 sm:$0xff]   ;;  %v2094_v25 = vld [vmem:[#allocation7 + $0x160] ss:$16 sps:$4 sm:$0xff]   ;;  %v2115_v52 = vld [vmem:[#allocation7 + $0x4c] ss:$16 sps:$4 sm:$0xff]  }
  0x7c   :  { %v2095_v26 = vld [vmem:[#allocation7 + $0x184] ss:$16 sps:$4 sm:$0xff]   ;;  %v2097_v28 = vld [vmem:[#allocation7 + $0x180] ss:$16 sps:$4 sm:$0xff]   ;;  %v2113_v53 = vld [vmem:[#allocation7 + $0x48] ss:$16 sps:$4 sm:$0xff]  }
  0x7d   :  { %535 = vmatpush1.bf16.msra.mxu1 %v2070_v7  ;;  %v2156_v29 = vld [vmem:[#allocation8] sm:$0xff]   ;;  %v2159_v33 = vld [vmem:[#allocation8 + $0x50] sm:$0xff]   ;;  %v2118_v54 = vld [vmem:[#allocation7 + $0x6c] ss:$16 sps:$4 sm:$0xff]  }
  0x7e   :  { %536 = vmatprep.subr.bf16.mxu1 %v2071_v8  ;;  %v2098_v30 = vld [vmem:[#allocation7 + $0x1a4] ss:$16 sps:$4 sm:$0xff]   ;;  %1995 = vmatpush3.bf16.msra.mxu0 %v2156_v29  ;;  %v2100_v34 = vld [vmem:[#allocation7 + $0x1a0] ss:$16 sps:$4 sm:$0xff]   ;;  %v2116_v55 = vld [vmem:[#allocation7 + $0x68] ss:$16 sps:$4 sm:$0xff]  }
  0x7f   :  { %1996 = vmatprep.subr.bf16.mxu0 %v2157_v31  ;;  %v2101_v35 = vld [vmem:[#allocation7 + $0x1c4] ss:$16 sps:$4 sm:$0xff]   ;;  %v2103_v38 = vld [vmem:[#allocation7 + $0x1c0] ss:$16 sps:$4 sm:$0xff]   ;;  %v2121_v56 = vld [vmem:[#allocation7 + $0x8c] ss:$16 sps:$4 sm:$0xff]  }
  0x80   :  { %v2160_v36 = vld [vmem:[#allocation8 + $0x10] sm:$0xff]   ;;  %v2163_v41 = vld [vmem:[#allocation8 + $0x60] sm:$0xff]   ;;  %v2119_v57 = vld [vmem:[#allocation7 + $0x88] ss:$16 sps:$4 sm:$0xff]  }
  0x81   :  { %537 = vmatpush1.bf16.msra.mxu1 %v2073_v9  ;;  %v2104_v39 = vld [vmem:[#allocation7 + $0x1e4] ss:$16 sps:$4 sm:$0xff]   ;;  %v2106_v42 = vld [vmem:[#allocation7 + $0x1e0] ss:$16 sps:$4 sm:$0xff]   ;;  %v2124_v58 = vld [vmem:[#allocation7 + $0xac] ss:$16 sps:$4 sm:$0xff]  }
  0x82   :  { %538 = vmatprep.subr.bf16.mxu1 %v2074_v10  ;;  %1997 = vmatpush3.bf16.msra.mxu0 %v2158_v32  ;;  %v2164_v44 = vld [vmem:[#allocation8 + $0x20] sm:$0xff]   ;;  %v2122_v59 = vld [vmem:[#allocation7 + $0xa8] ss:$16 sps:$4 sm:$0xff]   ;;  %v2127_v60 = vld [vmem:[#allocation7 + $0xcc] ss:$16 sps:$4 sm:$0xff]  }
  0x83   :  { %1998 = vmatprep.subr.bf16.mxu0 %v2159_v33  ;;  %v2125_v61 = vld [vmem:[#allocation7 + $0xc8] ss:$16 sps:$4 sm:$0xff]   ;;  %v2130_v62 = vld [vmem:[#allocation7 + $0xec] ss:$16 sps:$4 sm:$0xff]   ;;  %v2180_v29 = vld [vmem:[#allocation8 + $0xa0] sm:$0xff]  }
  0x84   :  { %v2128_v63 = vld [vmem:[#allocation7 + $0xe8] ss:$16 sps:$4 sm:$0xff]   ;;  %v2133_v0 = vld [vmem:[#allocation7 + $0x10c] ss:$16 sps:$4 sm:$0xff]   ;;  %v2183_v32 = vld [vmem:[#allocation8 + $0xf0] sm:$0xff]  }
  0x85   :  { %539 = vmatpush1.bf16.msra.mxu1 %v2076_v11  ;;  %v2131_v1 = vld [vmem:[#allocation7 + $0x108] ss:$16 sps:$4 sm:$0xff]   ;;  %v2136_v2 = vld [vmem:[#allocation7 + $0x12c] ss:$16 sps:$4 sm:$0xff]   ;;  %v2184_v33 = vld [vmem:[#allocation8 + $0xb0] sm:$0xff]  }
  0x86   :  { %540 = vmatprep.subr.bf16.mxu1 %v2077_v12  ;;  %1999 = vmatpush3.bf16.msra.mxu0 %v2160_v36  ;;  %v2134_v3 = vld [vmem:[#allocation7 + $0x128] ss:$16 sps:$4 sm:$0xff]   ;;  %v2139_v4 = vld [vmem:[#allocation7 + $0x14c] ss:$16 sps:$4 sm:$0xff]   ;;  %v188_v36 = vlaneseq }
  0x87   :  { %2000 = vmatprep.subr.bf16.mxu0 %v2161_v37  ;;  %v2137_v5 = vld [vmem:[#allocation7 + $0x148] ss:$16 sps:$4 sm:$0xff]   ;;  %v2142_v6 = vld [vmem:[#allocation7 + $0x16c] ss:$16 sps:$4 sm:$0xff]  }
  0x88   :  { %v2140_v7 = vld [vmem:[#allocation7 + $0x168] ss:$16 sps:$4 sm:$0xff]   ;;  %v2145_v8 = vld [vmem:[#allocation7 + $0x18c] ss:$16 sps:$4 sm:$0xff]   ;;  %v2707_v37 = vshrl.u32 %v188_v36, 7 }
  0x89   :  { %541 = vmatpush1.bf16.msra.mxu1 %v2079_v15  ;;  %v2143_v9 = vld [vmem:[#allocation7 + $0x188] ss:$16 sps:$4 sm:$0xff]   ;;  %v2148_v10 = vld [vmem:[#allocation7 + $0x1ac] ss:$16 sps:$4 sm:$0xff]  }
  0x8a   :  { %542 = vmatprep.subr.bf16.mxu1 %v2080_v16  ;;  %2001 = vmatpush3.bf16.msra.mxu0 %v2162_v40  ;;  %v2146_v11 = vld [vmem:[#allocation7 + $0x1a8] ss:$16 sps:$4 sm:$0xff]   ;;  %v2151_v12 = vld [vmem:[#allocation7 + $0x1cc] ss:$16 sps:$4 sm:$0xff]   ;;  %v2167_v16 = vld [vmem:[#allocation8 + $0x70] sm:$0xff]   ;;  %v2716_v40 = vsub.s32 1, %v2707_v37 }
  0x8b   :  { %2002 = vmatprep.subr.bf16.mxu0 %v2163_v41  ;;  %v2149_v13 = vld [vmem:[#allocation7 + $0x1c8] ss:$16 sps:$4 sm:$0xff]  }
  0x8c   :  { %v2152_v15 = vld [vmem:[#allocation7 + $0x1e8] ss:$16 sps:$4 sm:$0xff]  }
  0x8d   :  { %543 = vmatpush1.bf16.msra.mxu1 %v2082_v17  ;;  %v2168_v17 = vld [vmem:[#allocation8 + $0x30] sm:$0xff]   ;;  %v2178_v27 = vld [vmem:[#allocation8 + $0x98] sm:$0xff]   ;;  %v2182_v31 = vld [vmem:[#allocation8 + $0xa8] sm:$0xff]  }
  0x8e   :  { %544 = vmatprep.subr.bf16.mxu1 %v2083_v18  ;;  %2003 = vmatpush3.bf16.msra.mxu0 %v2164_v44  ;;  %v2169_v18 = vld [vmem:[#allocation8 + $0x78] sm:$0xff]  }
  0x8f   :  { %2004 = vmatprep.subr.bf16.mxu0 %v2165_v46 }
  0x91   :  { %545 = vmatpush1.bf16.msra.mxu1 %v2085_v19  ;;  %v2170_v19 = vld [vmem:[#allocation8 + $0x38] sm:$0xff]  }
  0x92   :  { %546 = vmatprep.subr.bf16.mxu1 %v2086_v20  ;;  %2005 = vmatpush3.bf16.msra.mxu0 %v2166_v50  ;;  %v2171_v20 = vld [vmem:[#allocation8 + $0xc0] sm:$0xff]  }
  0x93   :  { %2006 = vmatprep.subr.bf16.mxu0 %v2167_v16 }
  0x95   :  { %547 = vmatpush1.bf16.msra.mxu1 %v2088_v21  ;;  %v2172_v21 = vld [vmem:[#allocation8 + $0x80] sm:$0xff]  }
  0x96   :  { %548 = vmatprep.subr.bf16.mxu1 %v2089_v22  ;;  %2007 = vmatpush3.bf16.msra.mxu0 %v2168_v17  ;;  %v2173_v22 = vld [vmem:[#allocation8 + $0xc8] sm:$0xff]  }
  0x97   :  { %2008 = vmatprep.subr.bf16.mxu0 %v2169_v18 }
  0x99   :  { %549 = vmatpush1.bf16.msra.mxu1 %v2091_v23  ;;  %v2174_v23 = vld [vmem:[#allocation8 + $0x88] sm:$0xff]  }
  0x9a   :  { %550 = vmatprep.subr.bf16.mxu1 %v2092_v24  ;;  %2009 = vmatpush3.bf16.msra.mxu0 %v2170_v19  ;;  %v2175_v24 = vld [vmem:[#allocation8 + $0xd0] sm:$0xff]  }
  0x9d   :  { %551 = vmatpush1.bf16.msra.mxu1 %v2094_v25  ;;  %v2176_v25 = vld [vmem:[#allocation8 + $0x90] sm:$0xff]  }
  0x9e   :  { %552 = vmatprep.subr.bf16.mxu1 %v2095_v26  ;;  %v2177_v26 = vld [vmem:[#allocation8 + $0xd8] sm:$0xff]  }
  0xa1   :  { %553 = vmatpush1.bf16.msra.mxu1 %v2097_v28  ;;  %v2179_v28 = vld [vmem:[#allocation8 + $0xe0] sm:$0xff]  }
  0xa2   :  { %554 = vmatprep.subr.bf16.mxu1 %v2098_v30  ;;  %v2181_v30 = vld [vmem:[#allocation8 + $0xe8] sm:$0xff]  }
  0xa5   :  { %555 = vmatpush1.bf16.msra.mxu1 %v2100_v34  ;;  %v2185_v34 = vld [vmem:[#allocation8 + $0xf8] sm:$0xff]  }
  0xa6   :  { %556 = vmatprep.subr.bf16.mxu1 %v2101_v35  ;;  %v2186_v35 = vld [vmem:[#allocation8 + $0xb8] sm:$0xff]  }
  0xa9   :  { %557 = vmatpush1.bf16.msra.mxu1 %v2103_v38  ;;  %v2710_v38 = vsub.s32 0, %v2707_v37 }
  0xaa   :  { %558 = vmatprep.subr.bf16.mxu1 %v2104_v39  ;;  %v186_v39 = vld [vmem:[%s2780_s3] sm:$0xf] }
  0xab   :  { %v191_v41 = vrot.slane %v186_v39, %v2710_v38 }
  0xad   :  { %559 = vmatpush1.bf16.msra.mxu1 %v2106_v42  ;;  %v195_v42 = vrot.slane %v186_v39, %v2716_v40 }
  0xae   :  { %569 = vmatprep.subr.bf16.mxu1 %v2109_v45 }
  0xb0   :  { %561 = vmatmul.mubr.bf16.vlgmr.msra.gmra.mrb[0].mxu1 %v2702_v48 }
  0xb1   :  { %570 = vmatpush1.bf16.msra.mxu1 %v2107_v47  ;;  %601 = vmatprep.mubr.bf16.mxu1 %v2699_v14  ;;  %v2154_v14 = vld [vmem:[#allocation7 + $0x1ec] ss:$16 sps:$4 sm:$0xff]  }
  0xb2   :  { %571 = vmatprep.subr.bf16.mxu1 %v2112_v49 }
  0xb5   :  { %572 = vmatpush1.bf16.msra.mxu1 %v2110_v51 }
  0xb6   :  { %573 = vmatprep.subr.bf16.mxu1 %v2115_v52 }
  0xb9   :  { %574 = vmatpush1.bf16.msra.mxu1 %v2113_v53  ;;  %v198_v53 = vsub.s32 2, %v2707_v37 }
  0xba   :  { %575 = vmatprep.subr.bf16.mxu1 %v2118_v54  ;;  %v202_v54 = vsub.s32 3, %v2707_v37 }
  0xbd   :  { %576 = vmatpush1.bf16.msra.mxu1 %v2116_v55  ;;  %v199_v55 = vrot.slane %v186_v39, %v198_v53 }
  0xbe   :  { %577 = vmatprep.subr.bf16.mxu1 %v2121_v56  ;;  %v203_v56 = vrot.slane %v186_v39, %v202_v54  ;;  %v2541_v39 = vmov 0  }
  0xc1   :  { %578 = vmatpush1.bf16.msra.mxu1 %v2119_v57 }
  0xc2   :  { %579 = vmatprep.subr.bf16.mxu1 %v2124_v58 }
  0xc5   :  { %580 = vmatpush1.bf16.msra.mxu1 %v2122_v59 }
  0xc6   :  { %581 = vmatprep.subr.bf16.mxu1 %v2127_v60 }
  0xc9   :  { %582 = vmatpush1.bf16.msra.mxu1 %v2125_v61 }
  0xca   :  { %583 = vmatprep.subr.bf16.mxu1 %v2130_v62 }
  0xcd   :  { %584 = vmatpush1.bf16.msra.mxu1 %v2128_v63 }
  0xce   :  { %585 = vmatprep.subr.bf16.mxu1 %v2133_v0 }
  0xd1   :  { %586 = vmatpush1.bf16.msra.mxu1 %v2131_v1 }
  0xd2   :  { %587 = vmatprep.subr.bf16.mxu1 %v2136_v2 }
  0xd5   :  { %588 = vmatpush1.bf16.msra.mxu1 %v2134_v3  ;;  %v2187_v3 = vld [vmem:[#allocation10] ss:$16 sps:$4 sm:$0xff]  }
  0xd6   :  { %589 = vmatprep.subr.bf16.mxu1 %v2139_v4  ;;  %v2189_v4 = vld [vmem:[#allocation10 + $0x4] ss:$16 sps:$4 sm:$0xff]  }
  0xd7   :  { %1185 = vmatprep.subr.bf16.mxu0 %v2189_v4  ;;  %v2246_v4 = vld [vmem:[#allocation11 + $0x34] ss:$8 sps:$4 sm:$0xff]  }
  0xd9   :  { %590 = vmatpush1.bf16.msra.mxu1 %v2137_v5  ;;  %v2190_v5 = vld [vmem:[#allocation10 + $0x8] ss:$16 sps:$4 sm:$0xff]  }
  0xda   :  { %591 = vmatprep.subr.bf16.mxu1 %v2142_v6  ;;  %v2192_v6 = vld [vmem:[#allocation10 + $0xc] ss:$16 sps:$4 sm:$0xff]  }
  0xdd   :  { %592 = vmatpush1.bf16.msra.mxu1 %v2140_v7  ;;  %v2195_v7 = vld [vmem:[#allocation10 + $0x24] ss:$16 sps:$4 sm:$0xff]  }
  0xde   :  { %593 = vmatprep.subr.bf16.mxu1 %v2145_v8  ;;  %v2198_v8 = vld [vmem:[#allocation10 + $0x2c] ss:$16 sps:$4 sm:$0xff]  }
  0xe1   :  { %594 = vmatpush1.bf16.msra.mxu1 %v2143_v9  ;;  %v2193_v9 = vld [vmem:[#allocation10 + $0x20] ss:$16 sps:$4 sm:$0xff]  }
  0xe2   :  { %595 = vmatprep.subr.bf16.mxu1 %v2148_v10  ;;  %v2196_v10 = vld [vmem:[#allocation10 + $0x28] ss:$16 sps:$4 sm:$0xff]  }
  0xe5   :  { %596 = vmatpush1.bf16.msra.mxu1 %v2146_v11  ;;  %v2201_v11 = vld [vmem:[#allocation10 + $0x44] ss:$16 sps:$4 sm:$0xff]  }
  0xe6   :  { %597 = vmatprep.subr.bf16.mxu1 %v2151_v12  ;;  %v2204_v12 = vld [vmem:[#allocation10 + $0x4c] ss:$16 sps:$4 sm:$0xff]  }
  0xe9   :  { %598 = vmatpush1.bf16.msra.mxu1 %v2149_v13  ;;  %v2199_v13 = vld [vmem:[#allocation10 + $0x40] ss:$16 sps:$4 sm:$0xff]  }
  0xea   :  { %599 = vmatprep.subr.bf16.mxu1 %v2154_v14  ;;  %v2202_v14 = vld [vmem:[#allocation10 + $0x48] ss:$16 sps:$4 sm:$0xff]  }
  0xed   :  { %600 = vmatpush1.bf16.msra.mxu1 %v2152_v15 }
  0xee   :  { %2016 = vmatprep.subr.bf16.mxu1 %v2171_v20  ;;  %v2207_v20 = vld [vmem:[#allocation10 + $0x64] ss:$16 sps:$4 sm:$0xff]  }
  0xf0   :  { %602 = vmatmul.mubr.bf16.vlgmr.msra.gmra.mrb[4].mxu1 %v2702_v48 }
  0xf1   :  { %2017 = vmatpush3.bf16.msra.mxu1 %v2172_v21  ;;  %v2210_v21 = vld [vmem:[#allocation10 + $0x6c] ss:$16 sps:$4 sm:$0xff]  }
  0xf2   :  { %2018 = vmatprep.subr.bf16.mxu1 %v2173_v22  ;;  %v2205_v22 = vld [vmem:[#allocation10 + $0x60] ss:$16 sps:$4 sm:$0xff]  }
  0xf5   :  { %2019 = vmatpush3.bf16.msra.mxu1 %v2174_v23  ;;  %v2208_v23 = vld [vmem:[#allocation10 + $0x68] ss:$16 sps:$4 sm:$0xff]  }
  0xf6   :  { %2020 = vmatprep.subr.bf16.mxu1 %v2175_v24  ;;  %v2213_v24 = vld [vmem:[#allocation10 + $0x84] ss:$16 sps:$4 sm:$0xff]  }
  0xf9   :  { %2021 = vmatpush3.bf16.msra.mxu1 %v2176_v25  ;;  %v2216_v25 = vld [vmem:[#allocation10 + $0x8c] ss:$16 sps:$4 sm:$0xff]  }
  0xfa   :  { %2022 = vmatprep.subr.bf16.mxu1 %v2177_v26  ;;  %v2211_v26 = vld [vmem:[#allocation10 + $0x80] ss:$16 sps:$4 sm:$0xff]  }
  0xfd   :  { %2023 = vmatpush3.bf16.msra.mxu1 %v2178_v27  ;;  %v2214_v27 = vld [vmem:[#allocation10 + $0x88] ss:$16 sps:$4 sm:$0xff]  }
  0xfe   :  { %2024 = vmatprep.subr.bf16.mxu1 %v2179_v28  ;;  %v2219_v28 = vld [vmem:[#allocation10 + $0xa4] ss:$16 sps:$4 sm:$0xff]  }
 0x101   :  { %2025 = vmatpush3.bf16.msra.mxu1 %v2180_v29  ;;  %v2222_v29 = vld [vmem:[#allocation10 + $0xac] ss:$16 sps:$4 sm:$0xff]  }
 0x102   :  { %2026 = vmatprep.subr.bf16.mxu1 %v2181_v30  ;;  %v1863_v30 = vld [vmem:[%s2782_s5] ss:$0 sm:$0xff] }
 0x105   :  { %2027 = vmatpush3.bf16.msra.mxu1 %v2182_v31  ;;  %v2217_v31 = vld [vmem:[#allocation10 + $0xa0] ss:$16 sps:$4 sm:$0xff]  }
 0x106   :  { %2028 = vmatprep.subr.bf16.mxu1 %v2183_v32  ;;  %v2220_v32 = vld [vmem:[#allocation10 + $0xa8] ss:$16 sps:$4 sm:$0xff]  }
 0x109   :  { %2029 = vmatpush3.bf16.msra.mxu1 %v2184_v33 }
 0x10a   :  { %2030 = vmatprep.subr.bf16.mxu1 %v2185_v34  ;;  %v2225_v34 = vld [vmem:[#allocation10 + $0xc4] ss:$16 sps:$4 sm:$0xff]  }
 0x10d   :  { %2031 = vmatpush3.bf16.msra.mxu1 %v2186_v35  ;;  %v2228_v35 = vld [vmem:[#allocation10 + $0xcc] ss:$16 sps:$4 sm:$0xff]  }
 0x10e   :  { %1226 = vmatprep.subr.bf16.mxu1 %v2192_v6  ;;  %v2249_v6 = vld [vmem:[#allocation11 + $0x44] ss:$8 sps:$4 sm:$0xff]  }
 0x183   :  { %v562_v43 = vpop.f32.mrb[0].mxu1 }
 0x184   :  { %v563_v44 = vadd.f32 %v562_v43, %v191_v41  ;;  %v564_v45 = vpop.f32.mrb[1].mxu1 }
 0x185   :  { %v565_v46 = vadd.f32 %v564_v45, %v195_v42  ;;  %v566_v47 = vpop.f32.mrb[2].mxu1  ;;  %v2223_v45 = vld [vmem:[#allocation10 + $0xc0] ss:$16 sps:$4 sm:$0xff]  }
 0x186   :  { %v610_v48 = vmax.f32 %v563_v44, 0.0  ;;  %v567_v49 = vpop.f32.mrb[3].mxu1 }
 0x187   :  { %v611_v50 = vmax.f32 %v565_v46, 0.0  ;;  %v2226_v46 = vld [vmem:[#allocation10 + $0xc8] ss:$16 sps:$4 sm:$0xff]   ;;  %v2234_v49 = vld [vmem:[#allocation10 + $0xec] ss:$16 sps:$4 sm:$0xff]  }
 0x188   :  { %v614_v51 = vpack.c.bf16 %v610_v48, %v610_v48  ;;  %v2231_v48 = vld [vmem:[#allocation10 + $0xe4] ss:$16 sps:$4 sm:$0xff]  }
 0x189   :  { %v615_v52 = vpack.c.bf16 %v611_v50, %v611_v50  ;;  %v2229_v50 = vld [vmem:[#allocation10 + $0xe0] ss:$16 sps:$4 sm:$0xff]  }
 0x18b   :  { %913 = vmatprep.mubr.bf16.mxu0 %v615_v52  ;;  %v2237_v52 = vld [vmem:[#allocation11 + $0x4] ss:$8 sps:$4 sm:$0xff]  }
 0x18c   :  { %914 = vmatmul.mubr.bf16.vlgmr.msra.gmra.mrb[0].mxu0 %v614_v51  ;;  %v2232_v51 = vld [vmem:[#allocation10 + $0xe8] ss:$16 sps:$4 sm:$0xff]  }
 0x18d   :  { %1186 = vmatpush1.bf16.msra.mxu0 %v2187_v3  ;;  %1217 = vmatprep.mubr.bf16.mxu0 %v2541_v39  ;;  %v2241_v3 = vld [vmem:[#allocation11 + $0x20] ss:$8 sps:$4 sm:$0xff]  }
 0x18e   :  { %1187 = vmatprep.subr.bf16.mxu0 %v2195_v7  ;;  %v2247_v7 = vld [vmem:[#allocation11 + $0x40] ss:$8 sps:$4 sm:$0xff]  }
 0x191   :  { %1188 = vmatpush1.bf16.msra.mxu0 %v2193_v9  ;;  %v2250_v9 = vld [vmem:[#allocation11 + $0x50] ss:$8 sps:$4 sm:$0xff]  }
 0x192   :  { %1189 = vmatprep.subr.bf16.mxu0 %v2201_v11  ;;  %v2253_v11 = vld [vmem:[#allocation11 + $0x60] ss:$8 sps:$4 sm:$0xff]  }
 0x195   :  { %1190 = vmatpush1.bf16.msra.mxu0 %v2199_v13  ;;  %v2256_v13 = vld [vmem:[#allocation11 + $0x70] ss:$8 sps:$4 sm:$0xff]  }
 0x196   :  { %1191 = vmatprep.subr.bf16.mxu0 %v2207_v20  ;;  %v2270_v20 = vld [vmem:[#allocation11 + $0xb4] ss:$8 sps:$4 sm:$0xff]  }
 0x199   :  { %1192 = vmatpush1.bf16.msra.mxu0 %v2205_v22  ;;  %v2273_v22 = vld [vmem:[#allocation11 + $0xc4] ss:$8 sps:$4 sm:$0xff]  }
 0x19a   :  { %1193 = vmatprep.subr.bf16.mxu0 %v2213_v24  ;;  %v2276_v24 = vld [vmem:[#allocation11 + $0xd4] ss:$8 sps:$4 sm:$0xff]  }
 0x19d   :  { %1194 = vmatpush1.bf16.msra.mxu0 %v2211_v26  ;;  %v2279_v26 = vld [vmem:[#allocation11 + $0xe4] ss:$8 sps:$4 sm:$0xff]  }
 0x19e   :  { %1195 = vmatprep.subr.bf16.mxu0 %v2219_v28  ;;  %v2282_v28 = vld [vmem:[#allocation11 + $0xf4] ss:$8 sps:$4 sm:$0xff]  }
 0x1a1   :  { %1196 = vmatpush1.bf16.msra.mxu0 %v2217_v31  ;;  %v2733_v31 = vld [vmem:[%s2784_s7] sm:$0xf]  ;;  %s2542_s7 = smov [#allocation14]  }
 0x1a2   :  { %1197 = vmatprep.subr.bf16.mxu0 %v2225_v34  ;;  %v1020_v34 = vrot.slane %v2733_v31, %v202_v54  ;;  %s1783_s4 = sshll.u32 %s2542_s7, 4  ;;  %s1784_s4 = int_to_ptr.vmem [resolvable:$true] %s1783_s4 }
 0x1a3   :  { %s2473_s20 = scalar_lea.vmem %s1784_s4, 128  ;;  %p2478_p7 = scmp.lt.s32.totalorder %s1784_s4, %s1784_s4 }
 0x1a4   :  { %p2474_p6 = scmp.ne.s32.totalorder %s1784_s4, %s2473_s20  ;;  %p2479_p8 = scmp.lt.s32.totalorder %s2473_s20, %s2473_s20 }
 0x1a5   :  { %1198 = vmatpush1.bf16.msra.mxu0 %v2223_v45 }
 0x1a6   :  { %1199 = vmatprep.subr.bf16.mxu0 %v2231_v48  ;;  %p2480_p9 = por %p2479_p8, %p2478_p7 }
 0x1a8   :  { %p2481_p10 = pnand %p2480_p9, %p2474_p6 }
 0x1a9   :  { %1200 = vmatpush1.bf16.msra.mxu0 %v2229_v50 }
 0x1aa   :  { %1671 = vmatprep.subr.bf16.mxu0 %v2237_v52 }
 0x1c3   :  { %v603_v57 = vpop.f32.mrb[4].mxu1 }
 0x1c4   :  { %v604_v58 = vadd.f32 %v603_v57, %v199_v55  ;;  %v605_v59 = vpop.f32.mrb[5].mxu1 }
 0x1c5   :  { %v606_v60 = vadd.f32 %v605_v59, %v203_v56  ;;  %v607_v61 = vpop.f32.mrb[6].mxu1 }
 0x1c6   :  { %v612_v62 = vmax.f32 %v604_v58, 0.0  ;;  %v608_v63 = vpop.f32.mrb[7].mxu1  ;;  %v964_v58 = vld [vmem:[#allocation5] sm:$0xff] }
 0x1c7   :  { %v613_v0 = vmax.f32 %v606_v60, 0.0 }
 0x1c8   :  { %v616_v2 = vpack.c.bf16 %v612_v62, %v612_v62  ;;  %v2235_v62 = vld [vmem:[#allocation11] ss:$8 sps:$4 sm:$0xff]  }
 0x1c9   :  { %v617_v1 = vpack.c.bf16 %v613_v0, %v613_v0  ;;  %v2240_v0 = vld [vmem:[#allocation11 + $0x14] ss:$8 sps:$4 sm:$0xff]  }
 0x1cb   :  { %953 = vmatprep.mubr.bf16.mxu1 %v617_v1  ;;  %v2238_v1 = vld [vmem:[#allocation11 + $0x10] ss:$8 sps:$4 sm:$0xff]  }
 0x1cc   :  { %954 = vmatmul.mubr.bf16.vlgmr.msra.gmra.mrb[8].mxu1 %v616_v2  ;;  %v2243_v2 = vld [vmem:[#allocation11 + $0x24] ss:$8 sps:$4 sm:$0xff]  }
 0x1cd   :  { %1227 = vmatpush1.bf16.msra.mxu1 %v2190_v5  ;;  %1258 = vmatprep.mubr.bf16.mxu1 %v2541_v39  ;;  %v2244_v5 = vld [vmem:[#allocation11 + $0x30] ss:$8 sps:$4 sm:$0xff]  }
 0x1ce   :  { %1228 = vmatprep.subr.bf16.mxu1 %v2198_v8  ;;  %v2252_v8 = vld [vmem:[#allocation11 + $0x54] ss:$8 sps:$4 sm:$0xff]  }
 0x1d1   :  { %1229 = vmatpush1.bf16.msra.mxu1 %v2196_v10  ;;  %v2255_v10 = vld [vmem:[#allocation11 + $0x64] ss:$8 sps:$4 sm:$0xff]  }
 0x1d2   :  { %1230 = vmatprep.subr.bf16.mxu1 %v2204_v12  ;;  %v2258_v12 = vld [vmem:[#allocation11 + $0x74] ss:$8 sps:$4 sm:$0xff]  }
 0x1d5   :  { %1231 = vmatpush1.bf16.msra.mxu1 %v2202_v14  ;;  %v2261_v14 = vld [vmem:[#allocation11 + $0x84] ss:$8 sps:$4 sm:$0xff]  }
 0x1d6   :  { %1232 = vmatprep.subr.bf16.mxu1 %v2210_v21  ;;  %v2268_v21 = vld [vmem:[#allocation11 + $0xb0] ss:$8 sps:$4 sm:$0xff]  }
 0x1d9   :  { %1233 = vmatpush1.bf16.msra.mxu1 %v2208_v23  ;;  %v2271_v23 = vld [vmem:[#allocation11 + $0xc0] ss:$8 sps:$4 sm:$0xff]  }
 0x1da   :  { %1234 = vmatprep.subr.bf16.mxu1 %v2216_v25  ;;  %v2274_v25 = vld [vmem:[#allocation11 + $0xd0] ss:$8 sps:$4 sm:$0xff]  }
 0x1dd   :  { %1235 = vmatpush1.bf16.msra.mxu1 %v2214_v27  ;;  %v2277_v27 = vld [vmem:[#allocation11 + $0xe0] ss:$8 sps:$4 sm:$0xff]  }
 0x1de   :  { %1236 = vmatprep.subr.bf16.mxu1 %v2222_v29  ;;  %v2280_v29 = vld [vmem:[#allocation11 + $0xf0] ss:$8 sps:$4 sm:$0xff]  }
 0x1e1   :  { %1237 = vmatpush1.bf16.msra.mxu1 %v2220_v32  ;;  %v1008_v32 = vrot.slane %v2733_v31, %v2710_v38 }
 0x1e2   :  { %1238 = vmatprep.subr.bf16.mxu1 %v2228_v35 }
 0x1e5   :  { %1239 = vmatpush1.bf16.msra.mxu1 %v2226_v46 }
 0x1e6   :  { %1240 = vmatprep.subr.bf16.mxu1 %v2234_v49 }
 0x1e9   :  { %1241 = vmatpush1.bf16.msra.mxu1 %v2232_v51 }
 0x25f   :  { %v2010_v15 = vpop.f32.mrb[0].mxu0 }
 0x260   :  { %v2011_v16 = vpop.f32.mrb[1].mxu0 }
 0x261   :  { %v2012_v17 = vadd.f32 %v2011_v16, %v2010_v15  ;;  %v2013_v18 = vpop.f32.mrb[2].mxu0  ;;  %v2259_v15 = vld [vmem:[#allocation11 + $0x80] ss:$8 sps:$4 sm:$0xff]   ;;  %v2264_v16 = vld [vmem:[#allocation11 + $0x94] ss:$8 sps:$4 sm:$0xff]  }
 0x262   :  { %v2014_v19 = vpop.f32.mrb[3].mxu0  ;;  %v2267_v18 = vld [vmem:[#allocation11 + $0xa4] ss:$8 sps:$4 sm:$0xff]  }
 0x263   :  { %v916_v41 = vadd.f32 %v2012_v17, %v1863_v30  ;;  %v2262_v17 = vld [vmem:[#allocation11 + $0x90] ss:$8 sps:$4 sm:$0xff]   ;;  %v2265_v19 = vld [vmem:[#allocation11 + $0xa0] ss:$8 sps:$4 sm:$0xff]   ;;  %v2285_v30 = vld [vmem:[#allocation11 + $0x104] ss:$8 sps:$4 sm:$0xff]  }
 0x29f   :  { %v2032_v33 = vpop.f32.mrb[8].mxu1 }
 0x2a0   :  { %v2033_v36 = vpop.f32.mrb[9].mxu1 }
 0x2a1   :  { %v2034_v42 = vadd.f32 %v2033_v36, %v2032_v33  ;;  %v2035_v43 = vpop.f32.mrb[10].mxu1  ;;  %v1012_v33 = vrot.slane %v2733_v31, %v2716_v40 }
 0x2a2   :  { %v2036_v44 = vpop.f32.mrb[11].mxu1 }
 0x2a3   :  { %v956_v47 = vadd.f32 %v2034_v42, %v916_v41 }
 0x2a5   :  { %961 = vst [vmem:[#allocation14] sm:$0xff] %v956_v47  ;;  %962 = vrot.lane.b32.xlu0 %v956_v47, %s2531_s1 }
 0x317   :  { %v963_v55 = vpop.permute.xlu0 %962 }
 0x318   :  { %v965_v56 = vmul.f32 0.5, %v963_v55  ;;  %v2283_v55 = vld [vmem:[#allocation11 + $0x100] ss:$8 sps:$4 sm:$0xff]  }
 0x31a   :  { %v966_v57 = vmul.f32 1.442695, %v965_v56 }
 0x31c   :  { %2331 = vpow2.f32 %v966_v57  ;;  %v2288_v57 = vld [vmem:[#allocation11 + $0x114] ss:$8 sps:$4 sm:$0xff]  }
 0x326   :  { %v2332_v59 = vpop.eup %2331 }
 0x327   :  { %v968_v60 = vmul.f32 %v2332_v59, %v964_v58  ;;  %v2286_v58 = vld [vmem:[#allocation11 + $0x110] ss:$8 sps:$4 sm:$0xff]   ;;  %v2291_v59 = vld [vmem:[#allocation11 + $0x124] ss:$8 sps:$4 sm:$0xff]  }
 0x329   :  { %v969_v61 = vadd.f32 %v968_v60, %v956_v47  ;;  %v2289_v60 = vld [vmem:[#allocation11 + $0x120] ss:$8 sps:$4 sm:$0xff]  }
 0x32b   :  { %v970_v63 = vpack.c.bf16 %v969_v61, %v969_v61  ;;  %v2294_v61 = vld [vmem:[#allocation11 + $0x134] ss:$8 sps:$4 sm:$0xff]  }
 0x32d   :  { %1218 = vmatmul.mubr.bf16.vlgmr.msra.gmra.mrb[4].mxu0 %v970_v63  ;;  %1259 = vmatmul.mubr.bf16.vlgmr.msra.gmra.mrb[12].mxu1 %v970_v63  ;;  %v2297_v63 = vld [vmem:[#allocation11 + $0x144] ss:$8 sps:$4 sm:$0xff]  }
 0x32e   :  { %1672 = vmatpush1.bf16.msra.mxu0 %v2235_v62  ;;  %v2292_v62 = vld [vmem:[#allocation11 + $0x130] ss:$8 sps:$4 sm:$0xff]  }
 0x32f   :  { %1673 = vmatprep.subr.bf16.mxu0 %v2240_v0  ;;  %v2295_v0 = vld [vmem:[#allocation11 + $0x140] ss:$8 sps:$4 sm:$0xff]  }
 0x332   :  { %1674 = vmatpush1.bf16.msra.mxu0 %v2238_v1  ;;  %v2300_v1 = vld [vmem:[#allocation11 + $0x154] ss:$8 sps:$4 sm:$0xff]  }
 0x333   :  { %1675 = vmatprep.subr.bf16.mxu0 %v2243_v2  ;;  %v2298_v2 = vld [vmem:[#allocation11 + $0x150] ss:$8 sps:$4 sm:$0xff]  }
 0x336   :  { %1676 = vmatpush1.bf16.msra.mxu0 %v2241_v3  ;;  %v2303_v3 = vld [vmem:[#allocation11 + $0x164] ss:$8 sps:$4 sm:$0xff]  }
 0x337   :  { %1677 = vmatprep.subr.bf16.mxu0 %v2246_v4  ;;  %v2301_v4 = vld [vmem:[#allocation11 + $0x160] ss:$8 sps:$4 sm:$0xff]  }
 0x33a   :  { %1678 = vmatpush1.bf16.msra.mxu0 %v2244_v5  ;;  %v2306_v5 = vld [vmem:[#allocation11 + $0x174] ss:$8 sps:$4 sm:$0xff]  }
 0x33b   :  { %1679 = vmatprep.subr.bf16.mxu0 %v2249_v6  ;;  %v2304_v6 = vld [vmem:[#allocation11 + $0x170] ss:$8 sps:$4 sm:$0xff]  }
 0x33e   :  { %1680 = vmatpush1.bf16.msra.mxu0 %v2247_v7  ;;  %v2309_v7 = vld [vmem:[#allocation11 + $0x184] ss:$8 sps:$4 sm:$0xff]  }
 0x33f   :  { %1681 = vmatprep.subr.bf16.mxu0 %v2252_v8  ;;  %v2307_v8 = vld [vmem:[#allocation11 + $0x180] ss:$8 sps:$4 sm:$0xff]  }
 0x342   :  { %1682 = vmatpush1.bf16.msra.mxu0 %v2250_v9  ;;  %v2312_v9 = vld [vmem:[#allocation11 + $0x194] ss:$8 sps:$4 sm:$0xff]  }
 0x343   :  { %1683 = vmatprep.subr.bf16.mxu0 %v2255_v10  ;;  %v2310_v10 = vld [vmem:[#allocation11 + $0x190] ss:$8 sps:$4 sm:$0xff]  }
 0x346   :  { %1684 = vmatpush1.bf16.msra.mxu0 %v2253_v11  ;;  %v2315_v11 = vld [vmem:[#allocation11 + $0x1a4] ss:$8 sps:$4 sm:$0xff]  }
 0x347   :  { %1685 = vmatprep.subr.bf16.mxu0 %v2258_v12  ;;  %v2313_v12 = vld [vmem:[#allocation11 + $0x1a0] ss:$8 sps:$4 sm:$0xff]  }
 0x34a   :  { %1686 = vmatpush1.bf16.msra.mxu0 %v2256_v13  ;;  %v2318_v13 = vld [vmem:[#allocation11 + $0x1b4] ss:$8 sps:$4 sm:$0xff]  }
 0x34b   :  { %1687 = vmatprep.subr.bf16.mxu0 %v2261_v14  ;;  %v2316_v14 = vld [vmem:[#allocation11 + $0x1b0] ss:$8 sps:$4 sm:$0xff]  }
 0x34e   :  { %1688 = vmatpush1.bf16.msra.mxu0 %v2259_v15  ;;  %v2321_v15 = vld [vmem:[#allocation11 + $0x1c4] ss:$8 sps:$4 sm:$0xff]  }
 0x34f   :  { %1689 = vmatprep.subr.bf16.mxu0 %v2264_v16  ;;  %v2319_v16 = vld [vmem:[#allocation11 + $0x1c0] ss:$8 sps:$4 sm:$0xff]  }
 0x352   :  { %1690 = vmatpush1.bf16.msra.mxu0 %v2262_v17  ;;  %v2324_v17 = vld [vmem:[#allocation11 + $0x1d4] ss:$8 sps:$4 sm:$0xff]  }
 0x353   :  { %1691 = vmatprep.subr.bf16.mxu0 %v2267_v18  ;;  %v2322_v18 = vld [vmem:[#allocation11 + $0x1d0] ss:$8 sps:$4 sm:$0xff]  }
 0x356   :  { %1692 = vmatpush1.bf16.msra.mxu0 %v2265_v19  ;;  %v1016_v19 = vrot.slane %v2733_v31, %v198_v53 }
 0x357   :  { %1693 = vmatprep.subr.bf16.mxu0 %v2270_v20  ;;  %v2327_v20 = vld [vmem:[#allocation11 + $0x1e4] ss:$8 sps:$4 sm:$0xff]  }
 0x35a   :  { %1694 = vmatpush1.bf16.msra.mxu0 %v2268_v21  ;;  %v2325_v21 = vld [vmem:[#allocation11 + $0x1e0] ss:$8 sps:$4 sm:$0xff]  }
 0x35b   :  { %1695 = vmatprep.subr.bf16.mxu0 %v2273_v22 }
 0x35e   :  { %1696 = vmatpush1.bf16.msra.mxu0 %v2271_v23  ;;  %v2330_v23 = vld [vmem:[#allocation11 + $0x1f4] ss:$8 sps:$4 sm:$0xff]  }
 0x35f   :  { %1697 = vmatprep.subr.bf16.mxu0 %v2276_v24  ;;  %v2328_v24 = vld [vmem:[#allocation11 + $0x1f0] ss:$8 sps:$4 sm:$0xff]  }
 0x362   :  { %1698 = vmatpush1.bf16.msra.mxu0 %v2274_v25 }
 0x363   :  { %1699 = vmatprep.subr.bf16.mxu0 %v2279_v26 }
 0x366   :  { %1700 = vmatpush1.bf16.msra.mxu0 %v2277_v27 }
 0x367   :  { %1701 = vmatprep.subr.bf16.mxu0 %v2282_v28 }
 0x36a   :  { %1702 = vmatpush1.bf16.msra.mxu0 %v2280_v29 }
 0x36b   :  { %1712 = vmatprep.subr.bf16.mxu0 %v2285_v30 }
 0x400   :  { %v1219_v35 = vpop.f32.mrb[4].mxu0  ;;  %v2742_v36 = vpop.f32.mrb[12].mxu1 }
 0x401   :  { %v1220_v39 = vadd.f32 %v1219_v35, %v1008_v32  ;;  %v1221_v41 = vpop.f32.mrb[5].mxu0  ;;  %v1262_v42 = vpop.f32.mrb[13].mxu1  ;;  %v1261_v22 = vadd.f32 %v2742_v36, %v1016_v19 }
 0x402   :  { %v1222_v43 = vadd.f32 %v1221_v41, %v1012_v33  ;;  %v1263_v44 = vadd.f32 %v1262_v42, %v1020_v34  ;;  %v1223_v45 = vpop.f32.mrb[6].mxu0  ;;  %v1264_v46 = vpop.f32.mrb[14].mxu1 }
 0x403   :  { %v1267_v47 = vmax.f32 %v1220_v39, 0.0  ;;  %v1224_v48 = vpop.f32.mrb[7].mxu0  ;;  %v1265_v49 = vpop.f32.mrb[15].mxu1  ;;  %v1269_v25 = vmax.f32 %v1261_v22, 0.0 }
 0x404   :  { %v1268_v50 = vmax.f32 %v1222_v43, 0.0  ;;  %v1270_v51 = vmax.f32 %v1263_v44, 0.0 }
 0x405   :  { %v1271_v56 = vpack.c.bf16 %v1267_v47, %v1267_v47  ;;  %v1273_v26 = vpack.c.bf16 %v1269_v25, %v1269_v25 }
 0x406   :  { %v1272_v52 = vpack.c.bf16 %v1268_v50, %v1268_v50  ;;  %v1274_v54 = vpack.c.bf16 %v1270_v51, %v1270_v51 }
 0x408   :  { %1703 = vmatprep.mubr.bf16.mxu0 %v1272_v52 }
 0x409   :  { %1704 = vmatmul.mubr.bf16.vlgmr.msra.gmra.mrb[8].mxu0 %v1271_v56 }
 0x40a   :  { %1713 = vmatpush1.bf16.msra.mxu0 %v2283_v55  ;;  %1744 = vmatprep.mubr.bf16.mxu0 %v1274_v54 }
 0x40b   :  { %1714 = vmatprep.subr.bf16.mxu0 %v2288_v57 }
 0x40e   :  { %1715 = vmatpush1.bf16.msra.mxu0 %v2286_v58 }
 0x40f   :  { %1716 = vmatprep.subr.bf16.mxu0 %v2291_v59 }
 0x412   :  { %1717 = vmatpush1.bf16.msra.mxu0 %v2289_v60 }
 0x413   :  { %1718 = vmatprep.subr.bf16.mxu0 %v2294_v61 }
 0x416   :  { %1719 = vmatpush1.bf16.msra.mxu0 %v2292_v62 }
 0x417   :  { %1720 = vmatprep.subr.bf16.mxu0 %v2297_v63 }
 0x41a   :  { %1721 = vmatpush1.bf16.msra.mxu0 %v2295_v0 }
 0x41b   :  { %1722 = vmatprep.subr.bf16.mxu0 %v2300_v1 }
 0x41e   :  { %1723 = vmatpush1.bf16.msra.mxu0 %v2298_v2 }
 0x41f   :  { %1724 = vmatprep.subr.bf16.mxu0 %v2303_v3 }
 0x422   :  { %1725 = vmatpush1.bf16.msra.mxu0 %v2301_v4 }
 0x423   :  { %1726 = vmatprep.subr.bf16.mxu0 %v2306_v5 }
 0x426   :  { %1727 = vmatpush1.bf16.msra.mxu0 %v2304_v6 }
 0x427   :  { %1728 = vmatprep.subr.bf16.mxu0 %v2309_v7 }
 0x42a   :  { %1729 = vmatpush1.bf16.msra.mxu0 %v2307_v8 }
 0x42b   :  { %1730 = vmatprep.subr.bf16.mxu0 %v2312_v9 }
 0x42e   :  { %1731 = vmatpush1.bf16.msra.mxu0 %v2310_v10 }
 0x42f   :  { %1732 = vmatprep.subr.bf16.mxu0 %v2315_v11 }
 0x432   :  { %1733 = vmatpush1.bf16.msra.mxu0 %v2313_v12 }
 0x433   :  { %1734 = vmatprep.subr.bf16.mxu0 %v2318_v13 }
 0x436   :  { %1735 = vmatpush1.bf16.msra.mxu0 %v2316_v14 }
 0x437   :  { %1736 = vmatprep.subr.bf16.mxu0 %v2321_v15 }
 0x43a   :  { %1737 = vmatpush1.bf16.msra.mxu0 %v2319_v16 }
 0x43b   :  { %1738 = vmatprep.subr.bf16.mxu0 %v2324_v17 }
 0x43e   :  { %1739 = vmatpush1.bf16.msra.mxu0 %v2322_v18 }
 0x43f   :  { %1740 = vmatprep.subr.bf16.mxu0 %v2327_v20 }
 0x442   :  { %1741 = vmatpush1.bf16.msra.mxu0 %v2325_v21 }
 0x443   :  { %1742 = vmatprep.subr.bf16.mxu0 %v2330_v23 }
 0x446   :  { %1743 = vmatpush1.bf16.msra.mxu0 %v2328_v24 }
 0x449   :  { %1745 = vmatmul.mubr.bf16.vlgmr.msra.gmra.mrb[8].mxu0 %v1273_v26 }
 0x44a   :  { %2484 = shalt.err (!%p2481_p10)
}
 0x44b   :  { %s2485_s19 = scalar_lea.hbm %s2788_s11, 128 }
 0x44c   :  { %p2486_p11 = scmp.ne.s32.totalorder %s2788_s11, %s2485_s19  ;;  %p2489_p12 = scmp.lt.u32.totalorder %s2485_s19, %s2788_s11 }
 0x44e   :  { %p2491_p13 = pnand %p2489_p12, %p2486_p11 }
 0x450   :  { %2494 = shalt.err (!%p2491_p13)
}
 0x451   :  { %1786 = dma.vmem_to_hbm [thread:$0]  %s1784_s4, 128, %s2788_s11, [#allocation15]   ;;  %v1339_v37 = vld [vmem:[%s2786_s9] sm:$0x3] }
 0x452   :  { %v1344_v53 = vrot.slane %v1339_v37, %v2710_v38  ;;  %v1348_v27 = vrot.slane %v1339_v37, %v2716_v40  ;;  %s2543_s9 = smov [#allocation13]  }
 0x453   :  { %s1773_s11 = sshll.u32 %s2543_s9, 4  ;;  %s1774_s11 = int_to_ptr.vmem [resolvable:$true] %s1773_s11 }
 0x454   :  { %s2495_s28 = scalar_lea.vmem %s1774_s11, 256  ;;  %p2500_p1 = scmp.lt.s32.totalorder %s1774_s11, %s1774_s11 }
 0x455   :  { %p2496_p0 = scmp.ne.s32.totalorder %s1774_s11, %s2495_s28  ;;  %p2501_p2 = scmp.lt.s32.totalorder %s2495_s28, %s2495_s28 }
 0x457   :  { %p2502_p3 = por %p2501_p2, %p2500_p1 }
 0x459   :  { %p2503_p4 = pnand %p2502_p3, %p2496_p0 }
 0x51c   :  { %v1746_v28 = vpop.f32.mrb[8].mxu0 }
 0x51d   :  { %v2038_v29 = vadd.f32 %v1746_v28, %v1344_v53  ;;  %v1748_v30 = vpop.f32.mrb[9].mxu0 }
 0x51e   :  { %v2039_v31 = vadd.f32 %v1748_v30, %v1348_v27  ;;  %v1750_v32 = vpop.f32.mrb[10].mxu0 }
 0x51f   :  { %v1992_v33 = vmul.f32 -1.442695, %v2038_v29  ;;  %v1751_v34 = vpop.f32.mrb[11].mxu0 }
 0x520   :  { %v1993_v35 = vmul.f32 -1.442695, %v2039_v31 }
 0x521   :  { %2333 = vpow2.f32 %v1992_v33 }
 0x522   :  { %2335 = vpow2.f32 %v1993_v35 }
 0x52b   :  { %v2334_v36 = vpop.eup %2333 }
 0x52c   :  { %v2336_v39 = vpop.eup %2335  ;;  %v1759_v41 = vadd.f32 1.0, %v2334_v36 }
 0x52d   :  { %v1760_v42 = vadd.f32 1.0, %v2336_v39 }
 0x52e   :  { %2337 = vrcp.f32 %v1759_v41 }
 0x52f   :  { %2339 = vrcp.f32 %v1760_v42 }
 0x538   :  { %v2338_v38 = vpop.eup %2337 }
 0x539   :  { %v2340_v40 = vpop.eup %2339  ;;  %1765 = vst [vmem:[#allocation13] sm:$0xff] %v2338_v38 }
 0x53a   :  { %1766 = vst [vmem:[#allocation13 + $0x8] sm:$0xff] %v2340_v40 }
 0x53b   :  { %2506 = shalt.err (!%p2503_p4)
}
 0x53c   :  { %s2507_s13 = scalar_lea.hbm %s2787_s10, 256 }
 0x53d   :  { %p2508_p5 = scmp.ne.s32.totalorder %s2787_s10, %s2507_s13  ;;  %p2511_p6 = scmp.lt.u32.totalorder %s2507_s13, %s2787_s10 }
 0x53f   :  { %p2513_p7 = pnand %p2511_p6, %p2508_p5 }
 0x541   :  { %2516 = shalt.err (!%p2513_p7)
}
 0x542   :  { %1776 = dma.vmem_to_hbm [thread:$0]  %s1774_s11, 256, %s2787_s10, [#allocation4]  }
 0x543   :  { %2525 = dma.done.wait [#allocation4], 256  }
 0x544   :  { %2526 = vsyncadd [#allocation4], 4294967040 }
 0x545   :  { %2527 = dma.done.wait [#allocation15], 128  }
 0x546   :  { %2528 = vsyncadd [#allocation15], 4294967168 }
 0x547   :  { %1793 = vsyncpa [#allocation3], 1 }
 0x548   :  { %1794 = vsyncpa [#allocation6], 1 }
 0x549   :  { %1795 = vsyncpa [#allocation9], 1 }
 0x54a   :  { %1796 = vsyncpa [#allocation12], 1 }
 0x54b   :  { %1797 = vsyncpa [#allocation4], 1 }
 0x54c   :  { %1798 = vsyncpa [#allocation15], 1 }

</bundles_post_ra>
